<compile_context>
chip_gen: v7x
topology: tpu7x:2x2x1
jax: 0.10.0
libtpu: 0.0.40
codegen_flags: <defaults>
</compile_context>

<pallas_src>
import functools

import jax
import jax.numpy as jnp
from jax.experimental import pallas as pl
from jax.experimental.pallas import tpu as pltpu

_LANES = 128                    # vreg lane width
_SUBLANES = 8                   # f32 vreg sublanes
_CHUNK = _SUBLANES * _LANES     # 1024 samples == one (8,128) f32 vreg / feature


def _mlp_kernel(w1_ref, b1_ref, w2_ref, b2_ref, x_ref, o_ref):
    """One batch tile.

    w1_ref: (8, 4)      SMEM  (PyTorch layout: out x in)
    b1_ref: (8,)        SMEM
    w2_ref: (3, 8)      SMEM
    b2_ref: (3,)        SMEM
    x_ref : (4, S, 128) VMEM  features x sublane-rows x lanes (batch on rows+lanes)
    o_ref : (3, S, 128) VMEM  classes  x sublane-rows x lanes
    """
    n_chunks = x_ref.shape[1] // _SUBLANES

    # Register-resident inner loop over (8, 128) sub-chunks: the live set per
    # chunk is ~8 vregs, so everything stays in registers and the VPU (not
    # load/store) is the binding unit even at large tiles.
    @pl.loop(0, n_chunks)
    def _(c):
        r0 = pl.multiple_of(c * _SUBLANES, _SUBLANES)
        xr = [x_ref[k, pl.ds(r0, _SUBLANES), :] for k in range(4)]  # 4x (8,128)

        acc = [None] * 3
        # One hidden unit at a time: VPU broadcast-FMAs with scalar weights
        # from SMEM, ReLU, then fold straight into the 3 class accumulators.
        for j in range(8):
            hj = xr[0] * w1_ref[j, 0]
            for k in range(1, 4):
                hj = hj + xr[k] * w1_ref[j, k]
            hj = jnp.maximum(hj + b1_ref[j], 0.0)
            for m in range(3):
                t = hj * w2_ref[m, j]
                acc[m] = t if acc[m] is None else acc[m] + t

        # Direct per-class stores: full-vreg, unmasked vst (no concat / XLU).
        for m in range(3):
            o_ref[m, pl.ds(r0, _SUBLANES), :] = acc[m] + b2_ref[m]


def _round_up(x, m):
    return ((x + m - 1) // m) * m


@functools.partial(jax.jit, static_argnames=("block_b", "use_pallas"))
def net_forward(x, w1, b1, w2, b2, *, block_b=16384, use_pallas=None):
    """Forward pass of Net: relu(x @ W1.T + b1) @ W2.T + b2.

    x : (B, 4) float32 (PyTorch (batch, in_features) contract)
    w1: (8, 4), b1: (8,), w2: (3, 8), b2: (3,)  -- native PyTorch shapes.
    Returns (B, 3) float32 logits.
    """
    B = x.shape[0]
    x = x.astype(jnp.float32)

    if use_pallas is None:
        # Tiny batches (the actual iris case): one fused XLA expression beats
        # transposes + a pallas_call dispatch on every generation.
        use_pallas = B >= _CHUNK
    if not use_pallas:
        return jnp.maximum(x @ w1.T + b1, 0.0) @ w2.T + b2

    # --- tile sizing ---------------------------------------------------------
    # HBM-bound kernel (28 B/sample) with ~0.35 us fixed overhead per grid
    # step: ~16K samples/step (~450 KB) sits on the roofline for v5e/v6e/v7x.
    # Tiles are multiples of 1024 so block last-two dims are (8,128)-aligned
    # (this also fixes the previous "tb not forced to a multiple of 128" bug).
    bb = max(_CHUNK, (block_b // _CHUNK) * _CHUNK)
    b_chunks = _round_up(B, _CHUNK)
    tb = min(bb, b_chunks)
    # Keep >= 2 grid steps when the batch allows, so "parallel" can shard the
    # batch axis across both v7x TensorCores.
    if b_chunks >= 2 * _CHUNK and tb >= b_chunks:
        tb = _round_up(b_chunks // 2, _CHUNK)
    padded_b = _round_up(b_chunks, tb)
    s_tile = tb // _LANES              # sublane rows per grid step (mult. of 8)
    n_rows = padded_b // _LANES

    # Feature-major + (rows, 128) packing: the batch occupies sublanes AND
    # lanes, so every VPU op works on dense (8,128) vregs and stores are
    # unmasked.  The reshape after transpose+pad is a free metadata change.
    # NOTE: if the producer/consumer can use feature-major (4, B) / class-major
    # (3, B) directly, dropping these two transposes cuts end-to-end HBM
    # traffic a further ~2-3x.
    x_t = jnp.transpose(x)                              # (4, B)
    if padded_b != B:
        x_t = jnp.pad(x_t, ((0, 0), (0, padded_b - B)))
    x_t = x_t.reshape(4, n_rows, _LANES)

    grid = (padded_b // tb,)
    smem = pl.BlockSpec(memory_space=pltpu.MemorySpace.SMEM)

    flops = 2 * padded_b * (4 * 8 + 8 * 3)
    bytes_accessed = 4 * padded_b * (4 + 3) + 4 * (8 * 4 + 8 + 3 * 8 + 3)

    out_t = pl.pallas_call(
        _mlp_kernel,
        out_shape=jax.ShapeDtypeStruct((3, n_rows, _LANES), jnp.float32),
        grid=grid,
        in_specs=[
            smem, smem, smem, smem,                         # resident weights
            pl.BlockSpec((4, s_tile, _LANES), lambda i: (0, i, 0)),
        ],
        out_specs=pl.BlockSpec((3, s_tile, _LANES), lambda i: (0, i, 0)),
        compiler_params=pltpu.CompilerParams(
            dimension_semantics=("parallel",),              # both TCs on v7x
        ),
        cost_estimate=pl.CostEstimate(
            flops=flops, transcendentals=0, bytes_accessed=bytes_accessed),
    )(w1, b1, w2, b2, x_t)

    # Back to the public (B, 3) contract.
    out = out_t.reshape(3, padded_b)
    return jnp.transpose(out)[:B]


def init_params(key):
    """PyTorch-style U[-1/sqrt(fan_in), 1/sqrt(fan_in)] init, native shapes."""
    k1, k2, k3, k4 = jax.random.split(key, 4)
    bound1 = 1.0 / jnp.sqrt(4.0)
    bound2 = 1.0 / jnp.sqrt(8.0)
    w1 = jax.random.uniform(k1, (8, 4), jnp.float32, -bound1, bound1)
    b1 = jax.random.uniform(k2, (8,), jnp.float32, -bound1, bound1)
    w2 = jax.random.uniform(k3, (3, 8), jnp.float32, -bound2, bound2)
    b2 = jax.random.uniform(k4, (3,), jnp.float32, -bound2, bound2)
    return w1, b1, w2, b2


if __name__ == "__main__":
    key = jax.random.PRNGKey(0)
    k_x, k_p = jax.random.split(key)

    B = 8  # small batch of iris-like samples with 4 features each
    x = jax.random.normal(k_x, (B, 4), jnp.float32)
    w1, b1, w2, b2 = init_params(k_p)

    # Pure-JAX reference of the same forward pass
    # (PyTorch semantics: y = relu(x @ W1.T + b1) @ W2.T + b2).
    ref = jnp.maximum(x @ w1.T + b1, 0.0) @ w2.T + b2

    # Exercise the Pallas kernel path explicitly (B is tiny here)...
    out_kernel = jax.block_until_ready(
        net_forward(x, w1, b1, w2, b2, use_pallas=True))
    # ...and the auto-dispatching entry point (small-B fused-XLA fast path).
    out_auto = jax.block_until_ready(net_forward(x, w1, b1, w2, b2))

    assert out_kernel.shape == (B, 3)
    assert jnp.allclose(out_kernel, ref, atol=1e-5, rtol=1e-5)
    assert jnp.allclose(out_auto, ref, atol=1e-5, rtol=1e-5)

    print("KERNEL_OK")
</pallas_src>

<mosaic_0001>
module attributes {stable_mosaic.version = 11 : i64} {
  func.func @_mlp_kernel(%arg0: i32, %arg1: memref<8x4xf32, #tpu.memory_space<smem>>, %arg2: memref<8xf32, #tpu.memory_space<smem>>, %arg3: memref<3x8xf32, #tpu.memory_space<smem>>, %arg4: memref<3xf32, #tpu.memory_space<smem>>, %arg5: memref<4x8x128xf32, #tpu.memory_space<vmem>>, %arg6: memref<3x8x128xf32, #tpu.memory_space<vmem>>) attributes {dimension_semantics = [#tpu.dimension_semantics<parallel>], iteration_bounds = array<i64: 1>, scalar_prefetch = 0 : i64, scratch_operands = 0 : i64, tpu.core_type = #tpu.core_type<tc>, window_params = [{transform_indices = @transform_0, window_bounds = array<i64: 8, 4>}, {transform_indices = @transform_1, window_bounds = array<i64: 8>}, {transform_indices = @transform_2, window_bounds = array<i64: 3, 8>}, {transform_indices = @transform_3, window_bounds = array<i64: 3>}, {transform_indices = @transform_4, window_bounds = array<i64: 4, 8, 128>}, {transform_indices = @transform_5, window_bounds = array<i64: 3, 8, 128>}]} {
    %c0_i32 = arith.constant 0 : i32
    %c1_i32 = arith.constant 1 : i32
    %0 = arith.muli %c0_i32, %c1_i32 : i32
    %c0_i32_0 = arith.constant 0 : i32
    %1 = arith.addi %c0_i32_0, %0 : i32
    %c8_i32 = arith.constant 8 : i32
    %2 = arith.muli %1, %c8_i32 : i32
    %3 = tpu.assume_multiple %2, 8 : i32
    %c0 = arith.constant 0 : index
    %4 = arith.index_cast %3 : i32 to index
    %c0_1 = arith.constant 0 : index
    %5 = vector.load %arg5[%c0, %4, %c0_1] : memref<4x8x128xf32, #tpu.memory_space<vmem>>, vector<1x8x128xf32>
    %6 = vector.shape_cast %5 : vector<1x8x128xf32> to vector<8x128xf32>
    %c1 = arith.constant 1 : index
    %7 = arith.index_cast %3 : i32 to index
    %c0_2 = arith.constant 0 : index
    %8 = vector.load %arg5[%c1, %7, %c0_2] : memref<4x8x128xf32, #tpu.memory_space<vmem>>, vector<1x8x128xf32>
    %9 = vector.shape_cast %8 : vector<1x8x128xf32> to vector<8x128xf32>
    %c2 = arith.constant 2 : index
    %10 = arith.index_cast %3 : i32 to index
    %c0_3 = arith.constant 0 : index
    %11 = vector.load %arg5[%c2, %10, %c0_3] : memref<4x8x128xf32, #tpu.memory_space<vmem>>, vector<1x8x128xf32>
    %12 = vector.shape_cast %11 : vector<1x8x128xf32> to vector<8x128xf32>
    %c3 = arith.constant 3 : index
    %13 = arith.index_cast %3 : i32 to index
    %c0_4 = arith.constant 0 : index
    %14 = vector.load %arg5[%c3, %13, %c0_4] : memref<4x8x128xf32, #tpu.memory_space<vmem>>, vector<1x8x128xf32>
    %15 = vector.shape_cast %14 : vector<1x8x128xf32> to vector<8x128xf32>
    %c0_5 = arith.constant 0 : index
    %c0_6 = arith.constant 0 : index
    %16 = memref.load %arg1[%c0_5, %c0_6] : memref<8x4xf32, #tpu.memory_space<smem>>
    %17 = vector.broadcast %16 : f32 to vector<8x128xf32>
    %18 = arith.mulf %6, %17 : vector<8x128xf32>
    %c0_7 = arith.constant 0 : index
    %c1_8 = arith.constant 1 : index
    %19 = memref.load %arg1[%c0_7, %c1_8] : memref<8x4xf32, #tpu.memory_space<smem>>
    %20 = vector.broadcast %19 : f32 to vector<8x128xf32>
    %21 = arith.mulf %9, %20 : vector<8x128xf32>
    %22 = arith.addf %18, %21 : vector<8x128xf32>
    %c0_9 = arith.constant 0 : index
    %c2_10 = arith.constant 2 : index
    %23 = memref.load %arg1[%c0_9, %c2_10] : memref<8x4xf32, #tpu.memory_space<smem>>
    %24 = vector.broadcast %23 : f32 to vector<8x128xf32>
    %25 = arith.mulf %12, %24 : vector<8x128xf32>
    %26 = arith.addf %22, %25 : vector<8x128xf32>
    %c0_11 = arith.constant 0 : index
    %c3_12 = arith.constant 3 : index
    %27 = memref.load %arg1[%c0_11, %c3_12] : memref<8x4xf32, #tpu.memory_space<smem>>
    %28 = vector.broadcast %27 : f32 to vector<8x128xf32>
    %29 = arith.mulf %15, %28 : vector<8x128xf32>
    %30 = arith.addf %26, %29 : vector<8x128xf32>
    %c0_13 = arith.constant 0 : index
    %31 = memref.load %arg2[%c0_13] : memref<8xf32, #tpu.memory_space<smem>>
    %32 = vector.broadcast %31 : f32 to vector<8x128xf32>
    %33 = arith.addf %30, %32 : vector<8x128xf32>
    %cst = arith.constant 0.000000e+00 : f32
    %34 = vector.broadcast %cst : f32 to vector<8x128xf32>
    %35 = arith.maximumf %33, %34 : vector<8x128xf32>
    %c0_14 = arith.constant 0 : index
    %c0_15 = arith.constant 0 : index
    %36 = memref.load %arg3[%c0_14, %c0_15] : memref<3x8xf32, #tpu.memory_space<smem>>
    %37 = vector.broadcast %36 : f32 to vector<8x128xf32>
    %38 = arith.mulf %35, %37 : vector<8x128xf32>
    %c1_16 = arith.constant 1 : index
    %c0_17 = arith.constant 0 : index
    %39 = memref.load %arg3[%c1_16, %c0_17] : memref<3x8xf32, #tpu.memory_space<smem>>
    %40 = vector.broadcast %39 : f32 to vector<8x128xf32>
    %41 = arith.mulf %35, %40 : vector<8x128xf32>
    %c2_18 = arith.constant 2 : index
    %c0_19 = arith.constant 0 : index
    %42 = memref.load %arg3[%c2_18, %c0_19] : memref<3x8xf32, #tpu.memory_space<smem>>
    %43 = vector.broadcast %42 : f32 to vector<8x128xf32>
    %44 = arith.mulf %35, %43 : vector<8x128xf32>
    %c1_20 = arith.constant 1 : index
    %c0_21 = arith.constant 0 : index
    %45 = memref.load %arg1[%c1_20, %c0_21] : memref<8x4xf32, #tpu.memory_space<smem>>
    %46 = vector.broadcast %45 : f32 to vector<8x128xf32>
    %47 = arith.mulf %6, %46 : vector<8x128xf32>
    %c1_22 = arith.constant 1 : index
    %c1_23 = arith.constant 1 : index
    %48 = memref.load %arg1[%c1_22, %c1_23] : memref<8x4xf32, #tpu.memory_space<smem>>
    %49 = vector.broadcast %48 : f32 to vector<8x128xf32>
    %50 = arith.mulf %9, %49 : vector<8x128xf32>
    %51 = arith.addf %47, %50 : vector<8x128xf32>
    %c1_24 = arith.constant 1 : index
    %c2_25 = arith.constant 2 : index
    %52 = memref.load %arg1[%c1_24, %c2_25] : memref<8x4xf32, #tpu.memory_space<smem>>
    %53 = vector.broadcast %52 : f32 to vector<8x128xf32>
    %54 = arith.mulf %12, %53 : vector<8x128xf32>
    %55 = arith.addf %51, %54 : vector<8x128xf32>
    %c1_26 = arith.constant 1 : index
    %c3_27 = arith.constant 3 : index
    %56 = memref.load %arg1[%c1_26, %c3_27] : memref<8x4xf32, #tpu.memory_space<smem>>
    %57 = vector.broadcast %56 : f32 to vector<8x128xf32>
    %58 = arith.mulf %15, %57 : vector<8x128xf32>
    %59 = arith.addf %55, %58 : vector<8x128xf32>
    %c1_28 = arith.constant 1 : index
    %60 = memref.load %arg2[%c1_28] : memref<8xf32, #tpu.memory_space<smem>>
    %61 = vector.broadcast %60 : f32 to vector<8x128xf32>
    %62 = arith.addf %59, %61 : vector<8x128xf32>
    %cst_29 = arith.constant 0.000000e+00 : f32
    %63 = vector.broadcast %cst_29 : f32 to vector<8x128xf32>
    %64 = arith.maximumf %62, %63 : vector<8x128xf32>
    %c0_30 = arith.constant 0 : index
    %c1_31 = arith.constant 1 : index
    %65 = memref.load %arg3[%c0_30, %c1_31] : memref<3x8xf32, #tpu.memory_space<smem>>
    %66 = vector.broadcast %65 : f32 to vector<8x128xf32>
    %67 = arith.mulf %64, %66 : vector<8x128xf32>
    %68 = arith.addf %38, %67 : vector<8x128xf32>
    %c1_32 = arith.constant 1 : index
    %c1_33 = arith.constant 1 : index
    %69 = memref.load %arg3[%c1_32, %c1_33] : memref<3x8xf32, #tpu.memory_space<smem>>
    %70 = vector.broadcast %69 : f32 to vector<8x128xf32>
    %71 = arith.mulf %64, %70 : vector<8x128xf32>
    %72 = arith.addf %41, %71 : vector<8x128xf32>
    %c2_34 = arith.constant 2 : index
    %c1_35 = arith.constant 1 : index
    %73 = memref.load %arg3[%c2_34, %c1_35] : memref<3x8xf32, #tpu.memory_space<smem>>
    %74 = vector.broadcast %73 : f32 to vector<8x128xf32>
    %75 = arith.mulf %64, %74 : vector<8x128xf32>
    %76 = arith.addf %44, %75 : vector<8x128xf32>
    %c2_36 = arith.constant 2 : index
    %c0_37 = arith.constant 0 : index
    %77 = memref.load %arg1[%c2_36, %c0_37] : memref<8x4xf32, #tpu.memory_space<smem>>
    %78 = vector.broadcast %77 : f32 to vector<8x128xf32>
    %79 = arith.mulf %6, %78 : vector<8x128xf32>
    %c2_38 = arith.constant 2 : index
    %c1_39 = arith.constant 1 : index
    %80 = memref.load %arg1[%c2_38, %c1_39] : memref<8x4xf32, #tpu.memory_space<smem>>
    %81 = vector.broadcast %80 : f32 to vector<8x128xf32>
    %82 = arith.mulf %9, %81 : vector<8x128xf32>
    %83 = arith.addf %79, %82 : vector<8x128xf32>
    %c2_40 = arith.constant 2 : index
    %c2_41 = arith.constant 2 : index
    %84 = memref.load %arg1[%c2_40, %c2_41] : memref<8x4xf32, #tpu.memory_space<smem>>
    %85 = vector.broadcast %84 : f32 to vector<8x128xf32>
    %86 = arith.mulf %12, %85 : vector<8x128xf32>
    %87 = arith.addf %83, %86 : vector<8x128xf32>
    %c2_42 = arith.constant 2 : index
    %c3_43 = arith.constant 3 : index
    %88 = memref.load %arg1[%c2_42, %c3_43] : memref<8x4xf32, #tpu.memory_space<smem>>
    %89 = vector.broadcast %88 : f32 to vector<8x128xf32>
    %90 = arith.mulf %15, %89 : vector<8x128xf32>
    %91 = arith.addf %87, %90 : vector<8x128xf32>
    %c2_44 = arith.constant 2 : index
    %92 = memref.load %arg2[%c2_44] : memref<8xf32, #tpu.memory_space<smem>>
    %93 = vector.broadcast %92 : f32 to vector<8x128xf32>
    %94 = arith.addf %91, %93 : vector<8x128xf32>
    %cst_45 = arith.constant 0.000000e+00 : f32
    %95 = vector.broadcast %cst_45 : f32 to vector<8x128xf32>
    %96 = arith.maximumf %94, %95 : vector<8x128xf32>
    %c0_46 = arith.constant 0 : index
    %c2_47 = arith.constant 2 : index
    %97 = memref.load %arg3[%c0_46, %c2_47] : memref<3x8xf32, #tpu.memory_space<smem>>
    %98 = vector.broadcast %97 : f32 to vector<8x128xf32>
    %99 = arith.mulf %96, %98 : vector<8x128xf32>
    %100 = arith.addf %68, %99 : vector<8x128xf32>
    %c1_48 = arith.constant 1 : index
    %c2_49 = arith.constant 2 : index
    %101 = memref.load %arg3[%c1_48, %c2_49] : memref<3x8xf32, #tpu.memory_space<smem>>
    %102 = vector.broadcast %101 : f32 to vector<8x128xf32>
    %103 = arith.mulf %96, %102 : vector<8x128xf32>
    %104 = arith.addf %72, %103 : vector<8x128xf32>
    %c2_50 = arith.constant 2 : index
    %c2_51 = arith.constant 2 : index
    %105 = memref.load %arg3[%c2_50, %c2_51] : memref<3x8xf32, #tpu.memory_space<smem>>
    %106 = vector.broadcast %105 : f32 to vector<8x128xf32>
    %107 = arith.mulf %96, %106 : vector<8x128xf32>
    %108 = arith.addf %76, %107 : vector<8x128xf32>
    %c3_52 = arith.constant 3 : index
    %c0_53 = arith.constant 0 : index
    %109 = memref.load %arg1[%c3_52, %c0_53] : memref<8x4xf32, #tpu.memory_space<smem>>
    %110 = vector.broadcast %109 : f32 to vector<8x128xf32>
    %111 = arith.mulf %6, %110 : vector<8x128xf32>
    %c3_54 = arith.constant 3 : index
    %c1_55 = arith.constant 1 : index
    %112 = memref.load %arg1[%c3_54, %c1_55] : memref<8x4xf32, #tpu.memory_space<smem>>
    %113 = vector.broadcast %112 : f32 to vector<8x128xf32>
    %114 = arith.mulf %9, %113 : vector<8x128xf32>
    %115 = arith.addf %111, %114 : vector<8x128xf32>
    %c3_56 = arith.constant 3 : index
    %c2_57 = arith.constant 2 : index
    %116 = memref.load %arg1[%c3_56, %c2_57] : memref<8x4xf32, #tpu.memory_space<smem>>
    %117 = vector.broadcast %116 : f32 to vector<8x128xf32>
    %118 = arith.mulf %12, %117 : vector<8x128xf32>
    %119 = arith.addf %115, %118 : vector<8x128xf32>
    %c3_58 = arith.constant 3 : index
    %c3_59 = arith.constant 3 : index
    %120 = memref.load %arg1[%c3_58, %c3_59] : memref<8x4xf32, #tpu.memory_space<smem>>
    %121 = vector.broadcast %120 : f32 to vector<8x128xf32>
    %122 = arith.mulf %15, %121 : vector<8x128xf32>
    %123 = arith.addf %119, %122 : vector<8x128xf32>
    %c3_60 = arith.constant 3 : index
    %124 = memref.load %arg2[%c3_60] : memref<8xf32, #tpu.memory_space<smem>>
    %125 = vector.broadcast %124 : f32 to vector<8x128xf32>
    %126 = arith.addf %123, %125 : vector<8x128xf32>
    %cst_61 = arith.constant 0.000000e+00 : f32
    %127 = vector.broadcast %cst_61 : f32 to vector<8x128xf32>
    %128 = arith.maximumf %126, %127 : vector<8x128xf32>
    %c0_62 = arith.constant 0 : index
    %c3_63 = arith.constant 3 : index
    %129 = memref.load %arg3[%c0_62, %c3_63] : memref<3x8xf32, #tpu.memory_space<smem>>
    %130 = vector.broadcast %129 : f32 to vector<8x128xf32>
    %131 = arith.mulf %128, %130 : vector<8x128xf32>
    %132 = arith.addf %100, %131 : vector<8x128xf32>
    %c1_64 = arith.constant 1 : index
    %c3_65 = arith.constant 3 : index
    %133 = memref.load %arg3[%c1_64, %c3_65] : memref<3x8xf32, #tpu.memory_space<smem>>
    %134 = vector.broadcast %133 : f32 to vector<8x128xf32>
    %135 = arith.mulf %128, %134 : vector<8x128xf32>
    %136 = arith.addf %104, %135 : vector<8x128xf32>
    %c2_66 = arith.constant 2 : index
    %c3_67 = arith.constant 3 : index
    %137 = memref.load %arg3[%c2_66, %c3_67] : memref<3x8xf32, #tpu.memory_space<smem>>
    %138 = vector.broadcast %137 : f32 to vector<8x128xf32>
    %139 = arith.mulf %128, %138 : vector<8x128xf32>
    %140 = arith.addf %108, %139 : vector<8x128xf32>
    %c4 = arith.constant 4 : index
    %c0_68 = arith.constant 0 : index
    %141 = memref.load %arg1[%c4, %c0_68] : memref<8x4xf32, #tpu.memory_space<smem>>
    %142 = vector.broadcast %141 : f32 to vector<8x128xf32>
    %143 = arith.mulf %6, %142 : vector<8x128xf32>
    %c4_69 = arith.constant 4 : index
    %c1_70 = arith.constant 1 : index
    %144 = memref.load %arg1[%c4_69, %c1_70] : memref<8x4xf32, #tpu.memory_space<smem>>
    %145 = vector.broadcast %144 : f32 to vector<8x128xf32>
    %146 = arith.mulf %9, %145 : vector<8x128xf32>
    %147 = arith.addf %143, %146 : vector<8x128xf32>
    %c4_71 = arith.constant 4 : index
    %c2_72 = arith.constant 2 : index
    %148 = memref.load %arg1[%c4_71, %c2_72] : memref<8x4xf32, #tpu.memory_space<smem>>
    %149 = vector.broadcast %148 : f32 to vector<8x128xf32>
    %150 = arith.mulf %12, %149 : vector<8x128xf32>
    %151 = arith.addf %147, %150 : vector<8x128xf32>
    %c4_73 = arith.constant 4 : index
    %c3_74 = arith.constant 3 : index
    %152 = memref.load %arg1[%c4_73, %c3_74] : memref<8x4xf32, #tpu.memory_space<smem>>
    %153 = vector.broadcast %152 : f32 to vector<8x128xf32>
    %154 = arith.mulf %15, %153 : vector<8x128xf32>
    %155 = arith.addf %151, %154 : vector<8x128xf32>
    %c4_75 = arith.constant 4 : index
    %156 = memref.load %arg2[%c4_75] : memref<8xf32, #tpu.memory_space<smem>>
    %157 = vector.broadcast %156 : f32 to vector<8x128xf32>
    %158 = arith.addf %155, %157 : vector<8x128xf32>
    %cst_76 = arith.constant 0.000000e+00 : f32
    %159 = vector.broadcast %cst_76 : f32 to vector<8x128xf32>
    %160 = arith.maximumf %158, %159 : vector<8x128xf32>
    %c0_77 = arith.constant 0 : index
    %c4_78 = arith.constant 4 : index
    %161 = memref.load %arg3[%c0_77, %c4_78] : memref<3x8xf32, #tpu.memory_space<smem>>
    %162 = vector.broadcast %161 : f32 to vector<8x128xf32>
    %163 = arith.mulf %160, %162 : vector<8x128xf32>
    %164 = arith.addf %132, %163 : vector<8x128xf32>
    %c1_79 = arith.constant 1 : index
    %c4_80 = arith.constant 4 : index
    %165 = memref.load %arg3[%c1_79, %c4_80] : memref<3x8xf32, #tpu.memory_space<smem>>
    %166 = vector.broadcast %165 : f32 to vector<8x128xf32>
    %167 = arith.mulf %160, %166 : vector<8x128xf32>
    %168 = arith.addf %136, %167 : vector<8x128xf32>
    %c2_81 = arith.constant 2 : index
    %c4_82 = arith.constant 4 : index
    %169 = memref.load %arg3[%c2_81, %c4_82] : memref<3x8xf32, #tpu.memory_space<smem>>
    %170 = vector.broadcast %169 : f32 to vector<8x128xf32>
    %171 = arith.mulf %160, %170 : vector<8x128xf32>
    %172 = arith.addf %140, %171 : vector<8x128xf32>
    %c5 = arith.constant 5 : index
    %c0_83 = arith.constant 0 : index
    %173 = memref.load %arg1[%c5, %c0_83] : memref<8x4xf32, #tpu.memory_space<smem>>
    %174 = vector.broadcast %173 : f32 to vector<8x128xf32>
    %175 = arith.mulf %6, %174 : vector<8x128xf32>
    %c5_84 = arith.constant 5 : index
    %c1_85 = arith.constant 1 : index
    %176 = memref.load %arg1[%c5_84, %c1_85] : memref<8x4xf32, #tpu.memory_space<smem>>
    %177 = vector.broadcast %176 : f32 to vector<8x128xf32>
    %178 = arith.mulf %9, %177 : vector<8x128xf32>
    %179 = arith.addf %175, %178 : vector<8x128xf32>
    %c5_86 = arith.constant 5 : index
    %c2_87 = arith.constant 2 : index
    %180 = memref.load %arg1[%c5_86, %c2_87] : memref<8x4xf32, #tpu.memory_space<smem>>
    %181 = vector.broadcast %180 : f32 to vector<8x128xf32>
    %182 = arith.mulf %12, %181 : vector<8x128xf32>
    %183 = arith.addf %179, %182 : vector<8x128xf32>
    %c5_88 = arith.constant 5 : index
    %c3_89 = arith.constant 3 : index
    %184 = memref.load %arg1[%c5_88, %c3_89] : memref<8x4xf32, #tpu.memory_space<smem>>
    %185 = vector.broadcast %184 : f32 to vector<8x128xf32>
    %186 = arith.mulf %15, %185 : vector<8x128xf32>
    %187 = arith.addf %183, %186 : vector<8x128xf32>
    %c5_90 = arith.constant 5 : index
    %188 = memref.load %arg2[%c5_90] : memref<8xf32, #tpu.memory_space<smem>>
    %189 = vector.broadcast %188 : f32 to vector<8x128xf32>
    %190 = arith.addf %187, %189 : vector<8x128xf32>
    %cst_91 = arith.constant 0.000000e+00 : f32
    %191 = vector.broadcast %cst_91 : f32 to vector<8x128xf32>
    %192 = arith.maximumf %190, %191 : vector<8x128xf32>
    %c0_92 = arith.constant 0 : index
    %c5_93 = arith.constant 5 : index
    %193 = memref.load %arg3[%c0_92, %c5_93] : memref<3x8xf32, #tpu.memory_space<smem>>
    %194 = vector.broadcast %193 : f32 to vector<8x128xf32>
    %195 = arith.mulf %192, %194 : vector<8x128xf32>
    %196 = arith.addf %164, %195 : vector<8x128xf32>
    %c1_94 = arith.constant 1 : index
    %c5_95 = arith.constant 5 : index
    %197 = memref.load %arg3[%c1_94, %c5_95] : memref<3x8xf32, #tpu.memory_space<smem>>
    %198 = vector.broadcast %197 : f32 to vector<8x128xf32>
    %199 = arith.mulf %192, %198 : vector<8x128xf32>
    %200 = arith.addf %168, %199 : vector<8x128xf32>
    %c2_96 = arith.constant 2 : index
    %c5_97 = arith.constant 5 : index
    %201 = memref.load %arg3[%c2_96, %c5_97] : memref<3x8xf32, #tpu.memory_space<smem>>
    %202 = vector.broadcast %201 : f32 to vector<8x128xf32>
    %203 = arith.mulf %192, %202 : vector<8x128xf32>
    %204 = arith.addf %172, %203 : vector<8x128xf32>
    %c6 = arith.constant 6 : index
    %c0_98 = arith.constant 0 : index
    %205 = memref.load %arg1[%c6, %c0_98] : memref<8x4xf32, #tpu.memory_space<smem>>
    %206 = vector.broadcast %205 : f32 to vector<8x128xf32>
    %207 = arith.mulf %6, %206 : vector<8x128xf32>
    %c6_99 = arith.constant 6 : index
    %c1_100 = arith.constant 1 : index
    %208 = memref.load %arg1[%c6_99, %c1_100] : memref<8x4xf32, #tpu.memory_space<smem>>
    %209 = vector.broadcast %208 : f32 to vector<8x128xf32>
    %210 = arith.mulf %9, %209 : vector<8x128xf32>
    %211 = arith.addf %207, %210 : vector<8x128xf32>
    %c6_101 = arith.constant 6 : index
    %c2_102 = arith.constant 2 : index
    %212 = memref.load %arg1[%c6_101, %c2_102] : memref<8x4xf32, #tpu.memory_space<smem>>
    %213 = vector.broadcast %212 : f32 to vector<8x128xf32>
    %214 = arith.mulf %12, %213 : vector<8x128xf32>
    %215 = arith.addf %211, %214 : vector<8x128xf32>
    %c6_103 = arith.constant 6 : index
    %c3_104 = arith.constant 3 : index
    %216 = memref.load %arg1[%c6_103, %c3_104] : memref<8x4xf32, #tpu.memory_space<smem>>
    %217 = vector.broadcast %216 : f32 to vector<8x128xf32>
    %218 = arith.mulf %15, %217 : vector<8x128xf32>
    %219 = arith.addf %215, %218 : vector<8x128xf32>
    %c6_105 = arith.constant 6 : index
    %220 = memref.load %arg2[%c6_105] : memref<8xf32, #tpu.memory_space<smem>>
    %221 = vector.broadcast %220 : f32 to vector<8x128xf32>
    %222 = arith.addf %219, %221 : vector<8x128xf32>
    %cst_106 = arith.constant 0.000000e+00 : f32
    %223 = vector.broadcast %cst_106 : f32 to vector<8x128xf32>
    %224 = arith.maximumf %222, %223 : vector<8x128xf32>
    %c0_107 = arith.constant 0 : index
    %c6_108 = arith.constant 6 : index
    %225 = memref.load %arg3[%c0_107, %c6_108] : memref<3x8xf32, #tpu.memory_space<smem>>
    %226 = vector.broadcast %225 : f32 to vector<8x128xf32>
    %227 = arith.mulf %224, %226 : vector<8x128xf32>
    %228 = arith.addf %196, %227 : vector<8x128xf32>
    %c1_109 = arith.constant 1 : index
    %c6_110 = arith.constant 6 : index
    %229 = memref.load %arg3[%c1_109, %c6_110] : memref<3x8xf32, #tpu.memory_space<smem>>
    %230 = vector.broadcast %229 : f32 to vector<8x128xf32>
    %231 = arith.mulf %224, %230 : vector<8x128xf32>
    %232 = arith.addf %200, %231 : vector<8x128xf32>
    %c2_111 = arith.constant 2 : index
    %c6_112 = arith.constant 6 : index
    %233 = memref.load %arg3[%c2_111, %c6_112] : memref<3x8xf32, #tpu.memory_space<smem>>
    %234 = vector.broadcast %233 : f32 to vector<8x128xf32>
    %235 = arith.mulf %224, %234 : vector<8x128xf32>
    %236 = arith.addf %204, %235 : vector<8x128xf32>
    %c7 = arith.constant 7 : index
    %c0_113 = arith.constant 0 : index
    %237 = memref.load %arg1[%c7, %c0_113] : memref<8x4xf32, #tpu.memory_space<smem>>
    %238 = vector.broadcast %237 : f32 to vector<8x128xf32>
    %239 = arith.mulf %6, %238 : vector<8x128xf32>
    %c7_114 = arith.constant 7 : index
    %c1_115 = arith.constant 1 : index
    %240 = memref.load %arg1[%c7_114, %c1_115] : memref<8x4xf32, #tpu.memory_space<smem>>
    %241 = vector.broadcast %240 : f32 to vector<8x128xf32>
    %242 = arith.mulf %9, %241 : vector<8x128xf32>
    %243 = arith.addf %239, %242 : vector<8x128xf32>
    %c7_116 = arith.constant 7 : index
    %c2_117 = arith.constant 2 : index
    %244 = memref.load %arg1[%c7_116, %c2_117] : memref<8x4xf32, #tpu.memory_space<smem>>
    %245 = vector.broadcast %244 : f32 to vector<8x128xf32>
    %246 = arith.mulf %12, %245 : vector<8x128xf32>
    %247 = arith.addf %243, %246 : vector<8x128xf32>
    %c7_118 = arith.constant 7 : index
    %c3_119 = arith.constant 3 : index
    %248 = memref.load %arg1[%c7_118, %c3_119] : memref<8x4xf32, #tpu.memory_space<smem>>
    %249 = vector.broadcast %248 : f32 to vector<8x128xf32>
    %250 = arith.mulf %15, %249 : vector<8x128xf32>
    %251 = arith.addf %247, %250 : vector<8x128xf32>
    %c7_120 = arith.constant 7 : index
    %252 = memref.load %arg2[%c7_120] : memref<8xf32, #tpu.memory_space<smem>>
    %253 = vector.broadcast %252 : f32 to vector<8x128xf32>
    %254 = arith.addf %251, %253 : vector<8x128xf32>
    %cst_121 = arith.constant 0.000000e+00 : f32
    %255 = vector.broadcast %cst_121 : f32 to vector<8x128xf32>
    %256 = arith.maximumf %254, %255 : vector<8x128xf32>
    %c0_122 = arith.constant 0 : index
    %c7_123 = arith.constant 7 : index
    %257 = memref.load %arg3[%c0_122, %c7_123] : memref<3x8xf32, #tpu.memory_space<smem>>
    %258 = vector.broadcast %257 : f32 to vector<8x128xf32>
    %259 = arith.mulf %256, %258 : vector<8x128xf32>
    %260 = arith.addf %228, %259 : vector<8x128xf32>
    %c1_124 = arith.constant 1 : index
    %c7_125 = arith.constant 7 : index
    %261 = memref.load %arg3[%c1_124, %c7_125] : memref<3x8xf32, #tpu.memory_space<smem>>
    %262 = vector.broadcast %261 : f32 to vector<8x128xf32>
    %263 = arith.mulf %256, %262 : vector<8x128xf32>
    %264 = arith.addf %232, %263 : vector<8x128xf32>
    %c2_126 = arith.constant 2 : index
    %c7_127 = arith.constant 7 : index
    %265 = memref.load %arg3[%c2_126, %c7_127] : memref<3x8xf32, #tpu.memory_space<smem>>
    %266 = vector.broadcast %265 : f32 to vector<8x128xf32>
    %267 = arith.mulf %256, %266 : vector<8x128xf32>
    %268 = arith.addf %236, %267 : vector<8x128xf32>
    %c0_128 = arith.constant 0 : index
    %269 = memref.load %arg4[%c0_128] : memref<3xf32, #tpu.memory_space<smem>>
    %270 = vector.broadcast %269 : f32 to vector<8x128xf32>
    %271 = arith.addf %260, %270 : vector<8x128xf32>
    %c0_129 = arith.constant 0 : index
    %272 = arith.index_cast %3 : i32 to index
    %c0_130 = arith.constant 0 : index
    %273 = vector.load %arg6[%c0_129, %272, %c0_130] : memref<3x8x128xf32, #tpu.memory_space<vmem>>, vector<1x8x128xf32>
    %274 = vector.shape_cast %273 : vector<1x8x128xf32> to vector<8x128xf32>
    %275 = vector.shape_cast %271 : vector<8x128xf32> to vector<1x8x128xf32>
    tpu.vector_store %arg6[%c0_129, %272, %c0_130], %275 {strides = array<i32>} : memref<3x8x128xf32, #tpu.memory_space<vmem>>, vector<1x8x128xf32>,
    %c1_131 = arith.constant 1 : index
    %276 = memref.load %arg4[%c1_131] : memref<3xf32, #tpu.memory_space<smem>>
    %277 = vector.broadcast %276 : f32 to vector<8x128xf32>
    %278 = arith.addf %264, %277 : vector<8x128xf32>
    %c1_132 = arith.constant 1 : index
    %279 = arith.index_cast %3 : i32 to index
    %c0_133 = arith.constant 0 : index
    %280 = vector.load %arg6[%c1_132, %279, %c0_133] : memref<3x8x128xf32, #tpu.memory_space<vmem>>, vector<1x8x128xf32>
    %281 = vector.shape_cast %280 : vector<1x8x128xf32> to vector<8x128xf32>
    %282 = vector.shape_cast %278 : vector<8x128xf32> to vector<1x8x128xf32>
    tpu.vector_store %arg6[%c1_132, %279, %c0_133], %282 {strides = array<i32>} : memref<3x8x128xf32, #tpu.memory_space<vmem>>, vector<1x8x128xf32>,
    %c2_134 = arith.constant 2 : index
    %283 = memref.load %arg4[%c2_134] : memref<3xf32, #tpu.memory_space<smem>>
    %284 = vector.broadcast %283 : f32 to vector<8x128xf32>
    %285 = arith.addf %268, %284 : vector<8x128xf32>
    %c2_135 = arith.constant 2 : index
    %286 = arith.index_cast %3 : i32 to index
    %c0_136 = arith.constant 0 : index
    %287 = vector.load %arg6[%c2_135, %286, %c0_136] : memref<3x8x128xf32, #tpu.memory_space<vmem>>, vector<1x8x128xf32>
    %288 = vector.shape_cast %287 : vector<1x8x128xf32> to vector<8x128xf32>
    %289 = vector.shape_cast %285 : vector<8x128xf32> to vector<1x8x128xf32>
    tpu.vector_store %arg6[%c2_135, %286, %c0_136], %289 {strides = array<i32>} : memref<3x8x128xf32, #tpu.memory_space<vmem>>, vector<1x8x128xf32>,
    %c1_i32_137 = arith.constant 1 : i32
    return
  }
  func.func @transform_0(%arg0: i32) -> (i32, i32) {
    %c0_i32 = arith.constant 0 : i32
    %c0_i32_0 = arith.constant 0 : i32
    %c0_i32_1 = arith.constant 0 : i32
    return %c0_i32, %c0_i32_0 : i32, i32
  }
  func.func @transform_1(%arg0: i32) -> i32 {
    %c0_i32 = arith.constant 0 : i32
    %c0_i32_0 = arith.constant 0 : i32
    return %c0_i32 : i32
  }
  func.func @transform_2(%arg0: i32) -> (i32, i32) {
    %c0_i32 = arith.constant 0 : i32
    %c0_i32_0 = arith.constant 0 : i32
    %c0_i32_1 = arith.constant 0 : i32
    return %c0_i32, %c0_i32_0 : i32, i32
  }
  func.func @transform_3(%arg0: i32) -> i32 {
    %c0_i32 = arith.constant 0 : i32
    %c0_i32_0 = arith.constant 0 : i32
    return %c0_i32 : i32
  }
  func.func @transform_4(%arg0: i32) -> (i32, i32, i32) {
    %c0_i32 = arith.constant 0 : i32
    %c0_i32_0 = arith.constant 0 : i32
    %c0_i32_1 = arith.constant 0 : i32
    return %c0_i32, %arg0, %c0_i32_0 : i32, i32, i32
  }
  func.func @transform_5(%arg0: i32) -> (i32, i32, i32) {
    %c0_i32 = arith.constant 0 : i32
    %c0_i32_0 = arith.constant 0 : i32
    %c0_i32_1 = arith.constant 0 : i32
    return %c0_i32, %arg0, %c0_i32_0 : i32, i32, i32
  }
}

</mosaic_0001>

<bundles_post_ra>
// kernel: net_forward.1
= control target key start
LH: loop header
LB: loop body
LE: loop exit
PB: predicated region body
PF: predicated region fallthrough
CT: control target
= control target key end

     0   :  { %10 = vsyncpa [#allocation3], 0  ;;  %s753_s0 = inlined_call_operand.vmem [shape: f32[8,4], index: 0, kind: input, shape index: {}]   ;;  %s754_s1 = inlined_call_operand.vmem [shape: f32[8], index: 1, kind: input, shape index: {}]   ;;  %s755_s2 = inlined_call_operand.vmem [shape: f32[3,8], index: 2, kind: input, shape index: {}]   ;;  %s756_s3 = inlined_call_operand.vmem [shape: f32[3], index: 3, kind: input, shape index: {}]   ;;  %s757_s4 = inlined_call_operand.vmem [shape: f32[4,8,128], index: 4, kind: input, shape index: {}]   ;;  %s758_s5 = inlined_call_operand.vmem [shape: f32[3,8,128], index: 5, kind: output, shape index: {}]  }
   0x1   :  { %11 = vsyncpa [#allocation5], 0  ;;  %s29_s20 = sshll.u32 %s754_s1, 4  ;;  %s30_s20 = int_to_ptr.vmem [resolvable:$true] %s29_s20 }
   0x2   :  { %12 = vsyncpa [#allocation8], 0  ;;  %s19_s23 = sshll.u32 %s753_s0, 4  ;;  %s421_s24 = scalar_lea.vmem %s30_s20, 16  ;;  %s20_s23 = int_to_ptr.vmem [resolvable:$true] %s19_s23 }
   0x3   :  { %p422_p0 = scmp.ne.s32.totalorder %s30_s20, %s421_s24  ;;  %p426_p1 = scmp.lt.s32.totalorder %s30_s20, %s30_s20 }
   0x4   :  { %p427_p2 = scmp.lt.s32.totalorder %s421_s24, %s421_s24 }
   0x6   :  { %p428_p3 = por %p427_p2, %p426_p1 }
   0x8   :  { %p429_p4 = pnand %p428_p3, %p422_p0 }
   0xa   :  { %432 = shalt.err (!%p429_p4)
}
   0xb   :  { %s475_s25 = smov [#allocation4]   ;;  %s433_s26 = scalar_lea.vmem %s20_s23, 128 }
   0xc   :  { %32 = dma.vmem_to_smem %s30_s20, 16, %s475_s25, [#allocation5]  }
   0xd   :  { %p434_p5 = scmp.ne.s32.totalorder %s20_s23, %s433_s26  ;;  %p438_p6 = scmp.lt.s32.totalorder %s20_s23, %s20_s23 }
   0xe   :  { %p439_p7 = scmp.lt.s32.totalorder %s433_s26, %s433_s26 }
  0x10   :  { %p440_p8 = por %p439_p7, %p438_p6 }
  0x12   :  { %p441_p9 = pnand %p440_p8, %p434_p5 }
  0x14   :  { %444 = shalt.err (!%p441_p9)
}
  0x15   :  { %s476_s1 = smov [#allocation2]   ;;  %s39_s28 = sshll.u32 %s755_s2, 4  ;;  %s40_s28 = int_to_ptr.vmem [resolvable:$true] %s39_s28 }
  0x16   :  { %22 = dma.vmem_to_smem %s20_s23, 128, %s476_s1, [#allocation3]  }
  0x17   :  { %s49_s6 = sshll.u32 %s756_s3, 4  ;;  %s445_s7 = scalar_lea.vmem %s40_s28, 64  ;;  %s50_s6 = int_to_ptr.vmem [resolvable:$true] %s49_s6 }
  0x18   :  { %p446_p10 = scmp.ne.s32.totalorder %s40_s28, %s445_s7  ;;  %p450_p11 = scmp.lt.s32.totalorder %s40_s28, %s40_s28 }
  0x19   :  { %p451_p12 = scmp.lt.s32.totalorder %s445_s7, %s445_s7 }
  0x1b   :  { %p452_p13 = por %p451_p12, %p450_p11 }
  0x1d   :  { %p453_p0 = pnand %p452_p13, %p446_p10 }
  0x1f   :  { %456 = shalt.err (!%p453_p0)
}
  0x20   :  { %s477_s8 = smov [#allocation6]   ;;  %s457_s9 = scalar_lea.vmem %s50_s6, 16 }
  0x21   :  { %42 = dma.vmem_to_smem %s40_s28, 64, %s477_s8, [#allocation5]  }
  0x22   :  { %p458_p1 = scmp.ne.s32.totalorder %s50_s6, %s457_s9  ;;  %p462_p2 = scmp.lt.s32.totalorder %s50_s6, %s50_s6 }
  0x23   :  { %p463_p3 = scmp.lt.s32.totalorder %s457_s9, %s457_s9 }
  0x25   :  { %p464_p4 = por %p463_p3, %p462_p2 }
  0x27   :  { %p465_p5 = pnand %p464_p4, %p458_p1 }
  0x29   :  { %468 = shalt.err (!%p465_p5)
}
  0x2a   :  { %s478_s2 = smov [#allocation7]  }
  0x2b   :  { %52 = dma.vmem_to_smem %s50_s6, 16, %s478_s2, [#allocation8]  }
  0x2c   :  { %469 = dma.done.wait [#allocation3], 128  }
  0x2d   :  { %470 = vsyncadd [#allocation3], 4294967168 }
  0x2e   :  { %471 = dma.done.wait [#allocation5], 80  }
  0x2f   :  { %472 = vsyncadd [#allocation5], 4294967216 }
  0x30   :  { %473 = dma.done.wait [#allocation8], 16  }
  0x31   :  { %474 = vsyncadd [#allocation8], 4294967280 }
  0x32   :  { %67 = sfence }
  0x33   :  { %s78_s3 = sld [smem:[#allocation2]]  ;;  %s352_s10 = sld [smem:[#allocation2 + $0x1]]  ;;  %v530_v0 = vld [vmem:[%s757_s4] sm:$0xff]  ;;  %v537_v1 = vld [vmem:[%s757_s4 + $0x8] sm:$0xff]  ;;  %v542_v2 = vld [vmem:[%s757_s4 + $0x10] sm:$0xff] }
  0x34   :  { %s353_s11 = sld [smem:[#allocation2 + $0x2]]  ;;  %s354_s12 = sld [smem:[#allocation2 + $0x3]]  ;;  %v551_v4 = vld [vmem:[%s757_s4 + $0x18] sm:$0xff] }
  0x35   :  { %s521_s13 = sld [smem:[#allocation4]]  ;;  %s358_s24 = sld [smem:[#allocation2 + $0x81]] }
  0x36   :  { %s523_s14 = sld [smem:[#allocation6]]  ;;  %s359_s25 = sld [smem:[#allocation2 + $0x82]] }
  0x37   :  { %s525_s15 = sld [smem:[#allocation6 + $0x80]]  ;;  %s544_s26 = sld [smem:[#allocation2 + $0x83]] }
  0x38   :  { %s532_s18 = sld [smem:[#allocation6 + $0x100]]  ;;  %s546_s1 = sld [smem:[#allocation4 + $0x1]] }
  0x39   :  { %s357_s19 = sld [smem:[#allocation2 + $0x80]]  ;;  %v79_v3 = vstv %s78_s3  ;;  %v82_v6 = vstv %s352_s10  ;;  %s554_s28 = sld [smem:[#allocation6 + $0x1]] }
  0x3a   :  { %v80_v5 = vmul.f32 %v79_v3, %v530_v0  ;;  %v86_v7 = vstv %s353_s11  ;;  %s556_s29 = sld [smem:[#allocation6 + $0x81]]  ;;  %v83_v8 = vmul.f32 %v537_v1, %v82_v6  ;;  %v90_v10 = vstv %s354_s12  ;;  %s562_s6 = sld [smem:[#allocation2 + $0x100]] }
  0x3b   :  { %v87_v9 = vmul.f32 %v542_v2, %v86_v7  ;;  %s560_s30 = sld [smem:[#allocation6 + $0x101]]  ;;  %s566_s7 = sld [smem:[#allocation2 + $0x102]]  ;;  %v91_v12 = vmul.f32 %v551_v4, %v90_v10  ;;  %v110_v15 = vstv %s358_s24  ;;  %v94_v21 = vstv %s521_s13 }
  0x3c   :  { %s564_s4 = sld [smem:[#allocation2 + $0x101]]  ;;  %v84_v11 = vadd.f32 %v83_v8, %v80_v5  ;;  %s569_s8 = sld [smem:[#allocation2 + $0x103]]  ;;  %v114_v16 = vstv %s359_s25  ;;  %v111_v18 = vmul.f32 %v537_v1, %v110_v15  ;;  %v98_v22 = vstv %s523_s14 }
  0x3d   :  { %s571_s9 = sld [smem:[#allocation4 + $0x2]]  ;;  %v115_v19 = vmul.f32 %v542_v2, %v114_v16  ;;  %v118_v20 = vstv %s544_s26  ;;  %s581_s10 = sld [smem:[#allocation2 + $0x180]]  ;;  %v101_v23 = vstv %s525_s15 }
  0x3e   :  { %s574_s2 = sld [smem:[#allocation6 + $0x2]]  ;;  %v88_v17 = vadd.f32 %v87_v9, %v84_v11  ;;  %v104_v24 = vstv %s532_s18  ;;  %s587_s11 = sld [smem:[#allocation2 + $0x181]]  ;;  %v119_v27 = vmul.f32 %v551_v4, %v118_v20  ;;  %v122_v29 = vstv %s546_s1 }
  0x3f   :  { %v107_v13 = vstv %s357_s19  ;;  %s579_s3 = sld [smem:[#allocation6 + $0x82]]  ;;  %s593_s16 = sld [smem:[#allocation2 + $0x183]]  ;;  %v126_v35 = vstv %s554_s28 }
  0x40   :  { %v108_v14 = vmul.f32 %v107_v13, %v530_v0  ;;  %s589_s12 = sld [smem:[#allocation2 + $0x182]]  ;;  %v92_v25 = vadd.f32 %v91_v12, %v88_v17  ;;  %v138_v28 = vstv %s562_s6  ;;  %s603_s14 = sld [smem:[#allocation4 + $0x3]]  ;;  %v130_v37 = vstv %s556_s29 }
  0x41   :  { %v139_v30 = vmul.f32 %v138_v28, %v530_v0  ;;  %v145_v32 = vstv %s566_s7  ;;  %s599_s13 = sld [smem:[#allocation6 + $0x102]]  ;;  %v134_v38 = vstv %s560_s30  ;;  %s609_s15 = sld [smem:[#allocation2 + $0x200]] }
  0x42   :  { %v112_v26 = vadd.f32 %v111_v18, %v108_v14  ;;  %v141_v31 = vstv %s564_s4  ;;  %v95_v33 = vadd.f32 %v94_v21, %v92_v25  ;;  %v146_v39 = vmul.f32 %v542_v2, %v145_v32  ;;  %s611_s17 = sld [smem:[#allocation2 + $0x201]]  ;;  %s618_s18 = sld [smem:[#allocation6 + $0x3]] }
  0x43   :  { %v142_v36 = vmul.f32 %v537_v1, %v141_v31  ;;  %v149_v40 = vstv %s569_s8  ;;  %v153_v44 = vstv %s571_s9  ;;  %v169_v46 = vstv %s581_s10  ;;  %s620_s19 = sld [smem:[#allocation2 + $0x202]]  ;;  %s624_s20 = sld [smem:[#allocation6 + $0x83]] }
  0x44   :  { %v116_v34 = vadd.f32 %v115_v19, %v112_v26  ;;  %v96_v41 = vmax.f32 %v95_v33, 0.0  ;;  %v150_v45 = vmul.f32 %v551_v4, %v149_v40  ;;  %v172_v47 = vstv %s587_s11  ;;  %s626_s21 = sld [smem:[#allocation2 + $0x203]]  ;;  %s634_s23 = sld [smem:[#allocation4 + $0x4]] }
  0x45   :  { %v143_v43 = vadd.f32 %v142_v36, %v139_v30  ;;  %v157_v51 = vstv %s574_s2  ;;  %v161_v52 = vstv %s579_s3  ;;  %v170_v54 = vmul.f32 %v169_v46, %v530_v0  ;;  %s632_s22 = sld [smem:[#allocation6 + $0x103]]  ;;  %s638_s24 = sld [smem:[#allocation2 + $0x280]] }
  0x46   :  { %v120_v42 = vadd.f32 %v119_v27, %v116_v34  ;;  %v176_v48 = vstv %s589_s12  ;;  %v99_v49 = vmul.f32 %v98_v22, %v96_v41  ;;  %v173_v55 = vmul.f32 %v537_v1, %v172_v47  ;;  %s641_s25 = sld [smem:[#allocation2 + $0x281]]  ;;  %s643_s26 = sld [smem:[#allocation2 + $0x282]] }
  0x47   :  { %v147_v53 = vadd.f32 %v146_v39, %v143_v43  ;;  %v177_v56 = vmul.f32 %v542_v2, %v176_v48  ;;  %v102_v57 = vmul.f32 %v101_v23, %v96_v41  ;;  %v105_v58 = vmul.f32 %v104_v24, %v96_v41  ;;  %s648_s1 = sld [smem:[#allocation6 + $0x4]]  ;;  %s650_s0 = sld [smem:[#allocation2 + $0x283]] }
  0x48   :  { %v123_v50 = vadd.f32 %v122_v29, %v120_v42  ;;  %v180_v60 = vstv %s593_s16  ;;  %v165_v62 = vstv %s599_s13  ;;  %v174_v63 = vadd.f32 %v173_v55, %v170_v54  ;;  %s654_s27 = sld [smem:[#allocation6 + $0x84]]  ;;  %s662_s29 = sld [smem:[#allocation2 + $0x300]] }
  0x49   :  { %v151_v61 = vadd.f32 %v150_v45, %v147_v53  ;;  %v181_v3 = vmul.f32 %v551_v4, %v180_v60  ;;  %v184_v8 = vstv %s603_s14  ;;  %v200_v11 = vstv %s609_s15  ;;  %s656_s28 = sld [smem:[#allocation6 + $0x104]]  ;;  %s664_s30 = sld [smem:[#allocation2 + $0x301]] }
  0x4a   :  { %v124_v59 = vmax.f32 %v123_v50, 0.0  ;;  %v178_v10 = vadd.f32 %v177_v56, %v174_v63  ;;  %v203_v12 = vstv %s611_s17  ;;  %v201_v16 = vmul.f32 %v200_v11, %v530_v0  ;;  %s669_s6 = sld [smem:[#allocation4 + $0x5]]  ;;  %s673_s7 = sld [smem:[#allocation2 + $0x302]] }
  0x4b   :  { %v154_v9 = vadd.f32 %v153_v44, %v151_v61  ;;  %v204_v19 = vmul.f32 %v537_v1, %v203_v12  ;;  %v207_v20 = vstv %s620_s19  ;;  %v188_v21 = vstv %s618_s18  ;;  %s671_s4 = sld [smem:[#allocation6 + $0x5]]  ;;  %s675_s8 = sld [smem:[#allocation2 + $0x303]] }
  0x4c   :  { %v127_v5 = vmul.f32 %v126_v35, %v124_v59  ;;  %v131_v6 = vmul.f32 %v130_v37, %v124_v59  ;;  %v135_v7 = vmul.f32 %v134_v38, %v124_v59  ;;  %v182_v18 = vadd.f32 %v181_v3, %v178_v10  ;;  %s680_s9 = sld [smem:[#allocation6 + $0x85]]  ;;  %s688_s3 = sld [smem:[#allocation4 + $0x6]] }
  0x4d   :  { %v155_v17 = vmax.f32 %v154_v9, 0.0  ;;  %v192_v22 = vstv %s624_s20  ;;  %v208_v23 = vmul.f32 %v542_v2, %v207_v20  ;;  %v211_v24 = vstv %s626_s21  ;;  %s686_s2 = sld [smem:[#allocation6 + $0x105]]  ;;  %s693_s10 = sld [smem:[#allocation2 + $0x380]] }
  0x4e   :  { %v128_v13 = vadd.f32 %v127_v5, %v99_v49  ;;  %v132_v14 = vadd.f32 %v131_v6, %v102_v57  ;;  %v136_v15 = vadd.f32 %v135_v7, %v105_v58  ;;  %v185_v28 = vadd.f32 %v184_v8, %v182_v18  ;;  %s695_s11 = sld [smem:[#allocation2 + $0x381]]  ;;  %s698_s12 = sld [smem:[#allocation2 + $0x382]] }
  0x4f   :  { %v158_v25 = vmul.f32 %v157_v51, %v155_v17  ;;  %v162_v26 = vmul.f32 %v161_v52, %v155_v17  ;;  %v166_v27 = vmul.f32 %v165_v62, %v155_v17  ;;  %v196_v29 = vstv %s632_s22  ;;  %s702_s16 = sld [smem:[#allocation2 + $0x383]]  ;;  %s710_s13 = sld [smem:[#allocation6 + $0x6]] }
  0x50   :  { %v205_v30 = vadd.f32 %v204_v19, %v201_v16  ;;  %v212_v31 = vmul.f32 %v551_v4, %v211_v24  ;;  %v215_v32 = vstv %s634_s23  ;;  %v186_v36 = vmax.f32 %v185_v28, 0.0  ;;  %s713_s14 = sld [smem:[#allocation6 + $0x86]]  ;;  %s719_s17 = sld [smem:[#allocation4 + $0x7]] }
  0x51   :  { %v159_v33 = vadd.f32 %v158_v25, %v128_v13  ;;  %v163_v34 = vadd.f32 %v162_v26, %v132_v14  ;;  %v167_v35 = vadd.f32 %v166_v27, %v136_v15  ;;  %v231_v38 = vstv %s638_s24  ;;  %s715_s15 = sld [smem:[#allocation6 + $0x106]]  ;;  %s728_s18 = sld [smem:[#allocation6 + $0x7]] }
  0x52   :  { %v209_v37 = vadd.f32 %v208_v23, %v205_v30  ;;  %v234_v39 = vstv %s641_s25  ;;  %v238_v40 = vstv %s643_s26  ;;  %v189_v41 = vmul.f32 %v188_v21, %v186_v36  ;;  %s732_s19 = sld [smem:[#allocation6 + $0x87]]  ;;  %s323_s21 = sld [smem:[#allocation7]] }
  0x53   :  { %v193_v42 = vmul.f32 %v192_v22, %v186_v36  ;;  %v197_v43 = vmul.f32 %v196_v29, %v186_v36  ;;  %v232_v44 = vmul.f32 %v231_v38, %v530_v0  ;;  %v235_v46 = vmul.f32 %v537_v1, %v234_v39  ;;  %s734_s20 = sld [smem:[#allocation6 + $0x107]]  ;;  %s413_s22 = sld [smem:[#allocation7 + $0x1]] }
  0x54   :  { %v213_v45 = vadd.f32 %v212_v31, %v209_v37  ;;  %v239_v47 = vmul.f32 %v542_v2, %v238_v40  ;;  %v242_v48 = vstv %s650_s0  ;;  %v219_v49 = vstv %s648_s1  ;;  %s415_s23 = sld [smem:[#allocation7 + $0x2]] }
  0x55   :  { %v223_v50 = vstv %s654_s27  ;;  %v227_v51 = vstv %s656_s28  ;;  %v190_v52 = vadd.f32 %v189_v41, %v159_v33  ;;  %v236_v54 = vadd.f32 %v235_v46, %v232_v44 }
  0x56   :  { %v216_v53 = vadd.f32 %v215_v32, %v213_v45  ;;  %v243_v55 = vmul.f32 %v551_v4, %v242_v48  ;;  %v194_v56 = vadd.f32 %v193_v42, %v163_v34  ;;  %v198_v57 = vadd.f32 %v197_v43, %v167_v35 }
  0x57   :  { %v262_v58 = vstv %s662_s29  ;;  %v265_v59 = vstv %s664_s30  ;;  %v240_v61 = vadd.f32 %v239_v47, %v236_v54  ;;  %v246_v3 = vstv %s669_s6 }
  0x58   :  { %v217_v60 = vmax.f32 %v216_v53, 0.0  ;;  %v263_v62 = vmul.f32 %v262_v58, %v530_v0  ;;  %v266_v63 = vmul.f32 %v537_v1, %v265_v59  ;;  %v250_v5 = vstv %s671_s4 }
  0x59   :  { %v269_v6 = vstv %s673_s7  ;;  %v273_v7 = vstv %s675_s8  ;;  %v244_v10 = vadd.f32 %v243_v55, %v240_v61  ;;  %v254_v11 = vstv %s680_s9 }
  0x5a   :  { %v220_v8 = vmul.f32 %v219_v49, %v217_v60  ;;  %v224_v9 = vmul.f32 %v223_v50, %v217_v60  ;;  %v228_v12 = vmul.f32 %v227_v51, %v217_v60  ;;  %v267_v13 = vadd.f32 %v266_v63, %v263_v62 }
  0x5b   :  { %v270_v14 = vmul.f32 %v542_v2, %v269_v6  ;;  %v274_v15 = vmul.f32 %v551_v4, %v273_v7  ;;  %v247_v17 = vadd.f32 %v246_v3, %v244_v10  ;;  %v258_v18 = vstv %s686_s2 }
  0x5c   :  { %v221_v16 = vadd.f32 %v220_v8, %v190_v52  ;;  %v277_v19 = vstv %s688_s3  ;;  %v225_v20 = vadd.f32 %v224_v9, %v194_v56  ;;  %v293_v22 = vstv %s693_s10 }
  0x5d   :  { %v271_v21 = vadd.f32 %v270_v14, %v267_v13  ;;  %v296_v23 = vstv %s695_s11  ;;  %v248_v24 = vmax.f32 %v247_v17, 0.0  ;;  %v294_v25 = vmul.f32 %v293_v22, %v530_v0 }
  0x5e   :  { %v297_v26 = vmul.f32 %v537_v1, %v296_v23  ;;  %v300_v27 = vstv %s698_s12  ;;  %v229_v28 = vadd.f32 %v228_v12, %v198_v57  ;;  %v304_v31 = vstv %s702_s16 }
  0x5f   :  { %v275_v29 = vadd.f32 %v274_v15, %v271_v21  ;;  %v301_v30 = vmul.f32 %v542_v2, %v300_v27  ;;  %v251_v32 = vmul.f32 %v250_v5, %v248_v24  ;;  %v255_v0 = vmul.f32 %v254_v11, %v248_v24 }
  0x60   :  { %v259_v33 = vmul.f32 %v258_v18, %v248_v24  ;;  %v298_v34 = vadd.f32 %v297_v26, %v294_v25  ;;  %v305_v35 = vmul.f32 %v551_v4, %v304_v31  ;;  %v281_v36 = vstv %s710_s13 }
  0x61   :  { %v278_v1 = vadd.f32 %v277_v19, %v275_v29  ;;  %v285_v37 = vstv %s713_s14  ;;  %v289_v38 = vstv %s715_s15  ;;  %v308_v40 = vstv %s719_s17 }
  0x62   :  { %v302_v39 = vadd.f32 %v301_v30, %v298_v34  ;;  %v252_v41 = vadd.f32 %v251_v32, %v221_v16  ;;  %v256_v42 = vadd.f32 %v255_v0, %v225_v20  ;;  %v260_v43 = vadd.f32 %v259_v33, %v229_v28 }
  0x63   :  { %v279_v2 = vmax.f32 %v278_v1, 0.0  ;;  %v312_v48 = vstv %s728_s18  ;;  %v316_v49 = vstv %s732_s19  ;;  %v320_v50 = vstv %s734_s20 }
  0x64   :  { %v306_v44 = vadd.f32 %v305_v35, %v302_v39  ;;  %v324_v58 = vstv %s323_s21  ;;  %v328_v59 = vstv %s413_s22  ;;  %v333_v60 = vstv %s415_s23 }
  0x65   :  { %v282_v45 = vmul.f32 %v281_v36, %v279_v2  ;;  %v286_v46 = vmul.f32 %v285_v37, %v279_v2  ;;  %v290_v47 = vmul.f32 %v289_v38, %v279_v2 }
  0x66   :  { %v309_v4 = vadd.f32 %v308_v40, %v306_v44 }
  0x67   :  { %v283_v51 = vadd.f32 %v282_v45, %v252_v41  ;;  %v287_v52 = vadd.f32 %v286_v46, %v256_v42  ;;  %v291_v53 = vadd.f32 %v290_v47, %v260_v43 }
  0x68   :  { %v310_v54 = vmax.f32 %v309_v4, 0.0 }
  0x6a   :  { %v313_v55 = vmul.f32 %v312_v48, %v310_v54  ;;  %v317_v56 = vmul.f32 %v316_v49, %v310_v54  ;;  %v321_v57 = vmul.f32 %v320_v50, %v310_v54 }
  0x6c   :  { %v314_v61 = vadd.f32 %v313_v55, %v283_v51  ;;  %v318_v62 = vadd.f32 %v317_v56, %v287_v52  ;;  %v322_v63 = vadd.f32 %v321_v57, %v291_v53 }
  0x6e   :  { %v325_v3 = vadd.f32 %v324_v58, %v314_v61  ;;  %v329_v5 = vadd.f32 %v328_v59, %v318_v62  ;;  %v334_v6 = vadd.f32 %v333_v60, %v322_v63 }
  0x70   :  { %326 = vst [vmem:[%s758_s5] sm:$0xff] %v325_v3  ;;  %414 = vst [vmem:[%s758_s5 + $0x8] sm:$0xff] %v329_v5 }
  0x71   :  { %416 = vst [vmem:[%s758_s5 + $0x10] sm:$0xff] %v334_v6 }
  0x72   :  { %341 = vsyncpa [#allocation3], 1 }
  0x73   :  { %342 = vsyncpa [#allocation5], 1 }
  0x74   :  { %343 = vsyncpa [#allocation8], 1 }

</bundles_post_ra>
